<compile_context>
chip_gen: v5e
topology: v5e:2x2
jax: 0.10.0
libtpu: 0.0.40
codegen_flags: <defaults>
</compile_context>

<pallas_src>
import math

import jax
import jax.numpy as jnp
from jax.experimental import pallas as pl
from jax.experimental.pallas import tpu as pltpu


# ----------------------------------------------------------------------------
# Pass 1: term1 = sqrt( sum |W1 * W2| )   (weight-only, (1,1) f32 output)
# ----------------------------------------------------------------------------
def _term1_kernel(w1_ref, w2_ref, t1_ref):
    i = pl.program_id(0)
    j = pl.program_id(1)

    @pl.when(jnp.logical_and(i == 0, j == 0))
    def _():
        t1_ref[...] = jnp.zeros_like(t1_ref)

    uw = w1_ref[...].astype(jnp.float32) * w2_ref[...].astype(jnp.float32)
    t1_ref[...] += jnp.sum(jnp.abs(uw))

    @pl.when(jnp.logical_and(i == pl.num_programs(0) - 1,
                             j == pl.num_programs(1) - 1))
    def _():
        t1_ref[...] = jnp.sqrt(t1_ref[...])


# ----------------------------------------------------------------------------
# Pass 2: y = term1 * (x @ term2.T), accumulated over K tiles
# ----------------------------------------------------------------------------
def _spared_matmul_kernel(t1_ref, x_ref, w1_ref, w2_ref, o_ref, acc_ref):
    k = pl.program_id(2)

    @pl.when(k == 0)
    def _():
        acc_ref[...] = jnp.zeros_like(acc_ref)

    # Elementwise combine in f32 (v5e has no bf16 VPU/EUP); one sqrt per element.
    w1 = w1_ref[...].astype(jnp.float32)
    w2 = w2_ref[...].astype(jnp.float32)
    uw = w1 * w2
    s = jnp.sqrt(jnp.abs(uw))
    term2 = jnp.where(uw < 0, -s, s)                      # (bn, bk)

    # MXU operands in the input precision (bf16 stays bf16), f32 accumulation.
    x = x_ref[...]                                        # (bm, bk)
    term2 = term2.astype(x.dtype)

    # Contract last dims of both operands: x @ term2.T without materializing a transpose.
    acc_ref[...] += jax.lax.dot_general(
        x, term2,
        dimension_numbers=(((1,), (1,)), ((), ())),
        preferred_element_type=jnp.float32)

    @pl.when(k == pl.num_programs(2) - 1)
    def _():
        # term1 hoisted out of the weight combine: single scalar scale of (bm, bn).
        o_ref[...] = (acc_ref[...] * t1_ref[0, 0]).astype(o_ref.dtype)


def _pick_block(dim, target):
    """Full-extent block if the dim is small or not evenly tileable, else `target`."""
    if dim <= target or dim % target != 0:
        return dim
    return target


def spared_linear_regression(x, w1, w2, *, bm=128, bn=128, bk=256):
    batch, in_features = x.shape
    out_features = w1.shape[0]

    bm = _pick_block(batch, bm)
    bn = _pick_block(out_features, bn)
    bk = _pick_block(in_features, bk)

    # ---- Pass 1: weight-only global L1 reduce -> term1 scalar --------------
    term1 = pl.pallas_call(
        _term1_kernel,
        out_shape=jax.ShapeDtypeStruct((1, 1), jnp.float32),
        grid_spec=pltpu.PrefetchScalarGridSpec(
            num_scalar_prefetch=0,
            grid=(out_features // bn, in_features // bk),
            in_specs=[pl.BlockSpec((bn, bk), lambda i, j: (i, j)),
                      pl.BlockSpec((bn, bk), lambda i, j: (i, j))],
            out_specs=pl.BlockSpec((1, 1), lambda i, j: (0, 0)),
        ),
        compiler_params=pltpu.CompilerParams(
            dimension_semantics=("arbitrary", "arbitrary")),
        cost_estimate=pl.CostEstimate(
            flops=2 * out_features * in_features,
            transcendentals=1,
            bytes_accessed=2 * out_features * in_features * w1.dtype.itemsize + 4),
    )(w1, w2)

    # ---- Pass 2: tiled matmul with K-axis accumulator ----------------------
    itemsize = x.dtype.itemsize
    bytes_accessed = (batch * in_features * itemsize
                      + 2 * out_features * in_features * w1.dtype.itemsize
                      + batch * out_features * itemsize)

    y = pl.pallas_call(
        _spared_matmul_kernel,
        out_shape=jax.ShapeDtypeStruct((batch, out_features), x.dtype),
        grid_spec=pltpu.PrefetchScalarGridSpec(
            num_scalar_prefetch=0,
            grid=(batch // bm, out_features // bn, in_features // bk),
            in_specs=[
                pl.BlockSpec(memory_space=pltpu.MemorySpace.SMEM),        # term1 (1,1)
                pl.BlockSpec((bm, bk), lambda i, j, k: (i, k)),           # x
                pl.BlockSpec((bn, bk), lambda i, j, k: (j, k)),           # w1
                pl.BlockSpec((bn, bk), lambda i, j, k: (j, k)),           # w2
            ],
            out_specs=pl.BlockSpec((bm, bn), lambda i, j, k: (i, j)),
            scratch_shapes=[pltpu.VMEM((bm, bn), jnp.float32)],
        ),
        compiler_params=pltpu.CompilerParams(
            dimension_semantics=("parallel", "parallel", "arbitrary")),
        cost_estimate=pl.CostEstimate(
            flops=2 * batch * out_features * in_features,
            transcendentals=out_features * in_features,
            bytes_accessed=bytes_accessed),
    )(term1, x, w1, w2)
    return y


def reference(x, w1, w2):
    uw = w1 * w2
    term1 = jnp.sqrt(jnp.sum(jnp.abs(uw)))
    term2 = jnp.sign(w1) * jnp.sqrt(jnp.abs(w1)) * jnp.sign(w2) * jnp.sqrt(jnp.abs(w2))
    return x @ (term1 * term2).T


if __name__ == "__main__":
    batch, input_dim, output_dim = 8, 32, 16

    key = jax.random.PRNGKey(0)
    kx, kw1, kw2 = jax.random.split(key, 3)

    # Deterministic init mirroring kaiming_uniform_(a=sqrt(5)): bound = 1/sqrt(fan_in)
    bound = 1.0 / math.sqrt(input_dim)
    w1 = jax.random.uniform(kw1, (output_dim, input_dim), jnp.float32, -bound, bound)
    w2 = jax.random.uniform(kw2, (output_dim, input_dim), jnp.float32, -bound, bound)
    x = jax.random.normal(kx, (batch, input_dim), jnp.float32)

    y = spared_linear_regression(x, w1, w2)
    y = jax.block_until_ready(y)

    y_ref = reference(x, w1, w2)
    assert y.shape == (batch, output_dim)
    assert jnp.allclose(y, y_ref, atol=1e-5, rtol=1e-5), "mismatch vs JAX reference"

    print("KERNEL_OK")
</pallas_src>

<mosaic_0001>
module attributes {stable_mosaic.version = 11 : i64} {
  func.func @_term1_kernel(%arg0: i32, %arg1: i32, %arg2: memref<16x32xf32, #tpu.memory_space<vmem>>, %arg3: memref<16x32xf32, #tpu.memory_space<vmem>>, %arg4: memref<1x1xf32, #tpu.memory_space<vmem>>) attributes {dimension_semantics = [#tpu.dimension_semantics<arbitrary>, #tpu.dimension_semantics<arbitrary>], iteration_bounds = array<i64: 1, 1>, scalar_prefetch = 0 : i64, scratch_operands = 0 : i64, tpu.core_type = #tpu.core_type<tc>, window_params = [{transform_indices = @transform_0, window_bounds = array<i64: 16, 32>}, {transform_indices = @transform_1, window_bounds = array<i64: 16, 32>}, {pipeline_mode = #tpu.pipeline_mode<synchronous>, transform_indices = @transform_2, window_bounds = array<i64: 1, 1>}]} {
    %c0_i32 = arith.constant 0 : i32
    %0 = arith.cmpi eq, %arg0, %c0_i32 : i32
    %c0_i32_0 = arith.constant 0 : i32
    %1 = arith.cmpi eq, %arg1, %c0_i32_0 : i32
    %2 = arith.andi %0, %1 : i1
    %3 = arith.extui %2 : i1 to i32
    %c0_i32_1 = arith.constant 0 : i32
    %4 = arith.cmpi ne, %3, %c0_i32_1 : i32
    scf.if %4 {
      %cst_12 = arith.constant 0.000000e+00 : f32
      %22 = vector.broadcast %cst_12 : f32 to vector<1x1xf32>
      %c0_13 = arith.constant 0 : index
      %c0_14 = arith.constant 0 : index
      %23 = vector.load %arg4[%c0_13, %c0_14] : memref<1x1xf32, #tpu.memory_space<vmem>>, vector<1x1xf32>
      tpu.vector_store %arg4[%c0_13, %c0_14], %22 {strides = array<i32>} : memref<1x1xf32, #tpu.memory_space<vmem>>, vector<1x1xf32>,
    } else {
    }
    %c0 = arith.constant 0 : index
    %c0_2 = arith.constant 0 : index
    %5 = vector.load %arg2[%c0, %c0_2] : memref<16x32xf32, #tpu.memory_space<vmem>>, vector<16x32xf32>
    %c0_3 = arith.constant 0 : index
    %c0_4 = arith.constant 0 : index
    %6 = vector.load %arg3[%c0_3, %c0_4] : memref<16x32xf32, #tpu.memory_space<vmem>>, vector<16x32xf32>
    %7 = arith.mulf %5, %6 : vector<16x32xf32>
    %c0_5 = arith.constant 0 : index
    %c0_6 = arith.constant 0 : index
    %8 = vector.load %arg4[%c0_5, %c0_6] : memref<1x1xf32, #tpu.memory_space<vmem>>, vector<1x1xf32>
    %9 = math.absf %7 : vector<16x32xf32>
    %10 = vector.shape_cast %9 : vector<16x32xf32> to vector<1x16x32xf32>
    %cst = arith.constant dense<0.000000e+00> : vector<1xf32>
    %11 = vector.multi_reduction <add>, %10, %cst [1, 2] : vector<1x16x32xf32> to vector<1xf32>
    %12 = vector.shape_cast %11 : vector<1xf32> to vector<1x1x1xf32>
    %13 = vector.extract %12[0, 0, 0] : f32 from vector<1x1x1xf32>
    %14 = vector.broadcast %13 : f32 to vector<1x1xf32>
    %15 = arith.addf %8, %14 : vector<1x1xf32>
    %c0_7 = arith.constant 0 : index
    %c0_8 = arith.constant 0 : index
    %16 = vector.load %arg4[%c0_7, %c0_8] : memref<1x1xf32, #tpu.memory_space<vmem>>, vector<1x1xf32>
    tpu.vector_store %arg4[%c0_7, %c0_8], %15 {strides = array<i32>} : memref<1x1xf32, #tpu.memory_space<vmem>>, vector<1x1xf32>,
    %c0_i32_9 = arith.constant 0 : i32
    %17 = arith.cmpi eq, %arg0, %c0_i32_9 : i32
    %c0_i32_10 = arith.constant 0 : i32
    %18 = arith.cmpi eq, %arg1, %c0_i32_10 : i32
    %19 = arith.andi %17, %18 : i1
    %20 = arith.extui %19 : i1 to i32
    %c0_i32_11 = arith.constant 0 : i32
    %21 = arith.cmpi ne, %20, %c0_i32_11 : i32
    scf.if %21 {
      %c0_12 = arith.constant 0 : index
      %c0_13 = arith.constant 0 : index
      %22 = vector.load %arg4[%c0_12, %c0_13] : memref<1x1xf32, #tpu.memory_space<vmem>>, vector<1x1xf32>
      %23 = math.sqrt %22 : vector<1x1xf32>
      %c0_14 = arith.constant 0 : index
      %c0_15 = arith.constant 0 : index
      %24 = vector.load %arg4[%c0_14, %c0_15] : memref<1x1xf32, #tpu.memory_space<vmem>>, vector<1x1xf32>
      tpu.vector_store %arg4[%c0_14, %c0_15], %23 {strides = array<i32>} : memref<1x1xf32, #tpu.memory_space<vmem>>, vector<1x1xf32>,
    } else {
    }
    return
  }
  func.func @transform_0(%arg0: i32, %arg1: i32) -> (i32, i32) {
    %c0_i32 = arith.constant 0 : i32
    return %arg0, %arg1 : i32, i32
  }
  func.func @transform_1(%arg0: i32, %arg1: i32) -> (i32, i32) {
    %c0_i32 = arith.constant 0 : i32
    return %arg0, %arg1 : i32, i32
  }
  func.func @transform_2(%arg0: i32, %arg1: i32) -> (i32, i32) {
    %c0_i32 = arith.constant 0 : i32
    %c0_i32_0 = arith.constant 0 : i32
    %c0_i32_1 = arith.constant 0 : i32
    return %c0_i32, %c0_i32_0 : i32, i32
  }
}

</mosaic_0001>

<bundles_post_ra>
// kernel: tpu_custom_call.1
= control target key start
LH: loop header
LB: loop body
LE: loop exit
PB: predicated region body
PF: predicated region fallthrough
CT: control target
= control target key end

     0   :  { %7 = vsyncpa [#allocation3], 0  ;;  %s233_s0 = inlined_call_operand.hbm [shape: f32[16,32], index: 0, kind: input, shape index: {}]   ;;  %s234_s1 = inlined_call_operand.hbm [shape: f32[16,32], index: 1, kind: input, shape index: {}]   ;;  %s235_s2 = inlined_call_operand.hbm [shape: f32[1,1], index: 2, kind: output, shape index: {}]  }
   0x1   :  { %8 = vsyncpa [#allocation6], 0 }
   0x2   :  { %9 = vsyncpa [#allocation4], 0  ;;  %s14_s11 = sshll.u32 %s233_s0, 4  ;;  %s200_s12 = smov [#allocation2]   ;;  %s15_s11 = int_to_ptr.hbm [resolvable:$true] %s14_s11 }
   0x3   :  { %s16_s13 = sshll.u32 %s200_s12, 4  ;;  %s27_s16 = sshll.u32 %s234_s1, 4  ;;  %s17_s13 = int_to_ptr.vmem [resolvable:$true] %s16_s13  ;;  %s28_s16 = int_to_ptr.hbm [resolvable:$true] %s27_s16 }
   0x4   :  { %s201_s17 = smov 128   ;;  %s202_s18 = smov 8  }
   0x5   :  { %22 = dma.hbm_to_vmem [thread:$0]  %s15_s11, 256, %s17_s13, [#allocation3], %s201_s17, %s201_s17, %s202_s18  }
   0x6   :  { %s203_s19 = smov [#allocation5]  }
   0x7   :  { %s29_s20 = sshll.u32 %s203_s19, 4  ;;  %s30_s20 = int_to_ptr.vmem [resolvable:$true] %s29_s20 }
   0x8   :  { %35 = dma.hbm_to_vmem [thread:$0]  %s28_s16, 256, %s30_s20, [#allocation6], %s201_s17, %s201_s17, %s202_s18  }
   0x9   :  { %194 = dma.done.wait [#allocation3], 256  }
   0xa   :  { %195 = vsyncadd [#allocation3], 4294967040 }
   0xb   :  { %196 = dma.done.wait [#allocation6], 256  }
   0xc   :  { %197 = vsyncadd [#allocation6], 4294967040  ;;  %v52_v0 = vld [vmem:[#allocation2] sm:$0xff]  ;;  %v53_v1 = vld [vmem:[#allocation2 + $0x8] sm:$0xff]  ;;  %vm61_vm0 = vcmask 261120   ;;  %vm50_vm1 = vcmask 0  }
   0xd   :  { %v54_v2 = vld [vmem:[#allocation5] sm:$0xff]  ;;  %v55_v3 = vld [vmem:[#allocation5 + $0x8] sm:$0xff]  ;;  %v204_v11 = vmov 0.0   ;;  %s205_s1 = smov [#allocation7]   ;;  %s101_s24 = sshll.u32 %s235_s2, 4  ;;  %s102_s24 = int_to_ptr.hbm [resolvable:$true] %s101_s24 }
   0xe   :  { %v56_v4 = vmul.f32 %v54_v2, %v52_v0  ;;  %v57_v5 = vmul.f32 %v55_v3, %v53_v1  ;;  %51 = vst.msk [vmem:[#allocation7] sm:$0x1] %vm50_vm1, %v204_v11  ;;  %s99_s21 = sshll.u32 %s205_s1, 4  ;;  %s100_s21 = int_to_ptr.vmem [resolvable:$true] %s99_s21 }
  0x10   :  { %v59_v6 = vand.u32 2147483647, %v56_v4  ;;  %v60_v7 = vand.u32 2147483647, %v57_v5 }
  0x12   :  { %v62_v8 = vsel %vm61_vm0, %v59_v6, 0.0  ;;  %v63_v9 = vsel %vm61_vm0, %v60_v7, 0.0 }
  0x13   :  { %v64_v10 = vadd.f32 %v63_v9, %v62_v8 }
  0x15   :  { %65 = vadd.xlane.f32.xlu0 %v64_v10  ;;  %v58_v19 = vld [vmem:[#allocation7] sm:$0x1] }
  0x88   :  { %v66_v12 = vpop.xlane.xlu0 %65 }
  0x89   :  { %v67_v13 = vrot.slane %v66_v12, 4 }
  0x8b   :  { %v68_v14 = vadd.f32 %v67_v13, %v66_v12 }
  0x8d   :  { %v69_v15 = vrot.slane %v68_v14, 2 }
  0x8f   :  { %v70_v16 = vadd.f32 %v69_v15, %v68_v14 }
  0x91   :  { %v71_v17 = vrot.slane %v70_v16, 1 }
  0x93   :  { %v72_v18 = vadd.f32 %v71_v17, %v70_v16 }
  0x95   :  { %112 = vpush %v72_v18 }
  0xc6   :  { %s113_s0 = spop %112 }
  0xc7   :  { %v74_v20 = vstv %s113_s0 }
  0xc8   :  { %v75_v21 = vadd.f32 %v74_v20, %v58_v19 }
  0xca   :  { %77 = vst.msk [vmem:[#allocation7] sm:$0x1] %vm50_vm1, %v75_v21 }
  0xd1   :  { %v80_v22 = vld [vmem:[#allocation7] sm:$0x1] }
  0xd2   :  { %120 = vrsqrt.f32 %v80_v22  ;;  %vm88_vm2 = vcmp.eq.f32.partialorder %v80_v22, inf  ;;  %v91_v30 = vand.u32 2147483648, %v80_v22  ;;  %vm90_vm3 = vcmp.eq.f32.partialorder %v80_v22, 0.0 }
  0xd8   :  { %v121_v23 = vpop.eup %120 }
  0xd9   :  { %v82_v24 = vmul.f32 %v121_v23, %v80_v22 }
  0xdb   :  { %v83_v25 = vmul.f32 %v121_v23, %v82_v24 }
  0xdd   :  { %v84_v26 = vmul.f32 0.5, %v83_v25 }
  0xdf   :  { %v85_v27 = vsub.f32 1.5, %v84_v26 }
  0xe1   :  { %v86_v28 = vmul.f32 %v121_v23, %v85_v27 }
  0xe3   :  { %v87_v29 = vmul.f32 %v86_v28, %v80_v22 }
  0xe5   :  { %v89_v31 = vsel %vm88_vm2, %v80_v22, %v87_v29 }
  0xe6   :  { %v92_v32 = vsel %vm90_vm3, %v91_v30, %v89_v31 }
  0xe7   :  { %93 = vst.msk [vmem:[#allocation7] sm:$0x1] %vm50_vm1, %v92_v32 }
  0xe8   :  { %104 = dma.vmem_to_hbm [thread:$0]  %s100_s21, 16, %s102_s24, [#allocation4]  }
  0xe9   :  { %198 = dma.done.wait [#allocation4], 16  }
  0xea   :  { %199 = vsyncadd [#allocation4], 4294967280 }
  0xeb   :  { %109 = vsyncpa [#allocation3], 1 }
  0xec   :  { %110 = vsyncpa [#allocation6], 1 }
  0xed   :  { %111 = vsyncpa [#allocation4], 1 }

</bundles_post_ra>
